<compile_context>
chip_gen: v6e
topology: v6e:2x2x1
jax: 0.10.0
libtpu: 0.0.40
codegen_flags: <defaults>
</compile_context>

<pallas_src>
import jax
import jax.numpy as jnp
from jax import lax
from jax.experimental import pallas as pl
from jax.experimental.pallas import tpu as pltpu


# ----------------------------------------------------------------------------
# Pallas kernel: block_b batch elements per grid step, (C, N) working layout.
# ----------------------------------------------------------------------------
def _gap_kernel(x_ref, wx_ref, bx_ref, w2_ref, b2_ref, out_ref):
    kp = wx_ref.shape[0] - 8              # padded hidden size (static)
    wx = wx_ref[...]                      # (kp+8, C): [W1; 0-pad; wv_bar; ones-row; 0]
    bx = bx_ref[...]                      # (kp+8, 1)
    w2 = w2_ref[...]                      # (C, kp)   zero-padded contraction dim
    b2 = b2_ref[...]                      # (C, 1)

    for b in range(x_ref.shape[0]):       # static unroll over the batch block
        x = x_ref[b]                      # (C, N) lane-dense

        # One fused matmul on x: attention hidden rows + vbar row + ones row.
        full = jnp.dot(wx, x, preferred_element_type=jnp.float32) + bx   # (kp+8, N)
        h = jnp.maximum(full[:kp, :], 0.0)        # (kp, N) ReLU(W1 x + b1); pad rows are 0
        vo = full[kp:, :]                         # (8, N): row0 = vbar, row1 = ones

        # Attention logits (second 1x1 conv).
        logits = jnp.dot(w2, h, preferred_element_type=jnp.float32) + b2  # (C, N)

        # Max-stabilized, UNNORMALIZED softmax over the spatial (lane) axis.
        m = jnp.max(logits, axis=-1, keepdims=True)     # (C, 1)
        e = jnp.exp(logits - m)                         # (C, N)  (EUP)

        # Single contraction over N gives numerator (vbar . e_i) in row 0 and
        # the softmax denominator (sum_n e_i) in row 1.
        res = lax.dot_general(vo, e, (((1,), (1,)), ((), ())),
                              preferred_element_type=jnp.float32)         # (8, C)
        out_ref[b] = res[0:1, :] / res[1:2, :]          # (1, C), exact division


# ----------------------------------------------------------------------------
# Wrapper: weight folding / fusion + pallas_call (no transposes anywhere)
# ----------------------------------------------------------------------------
def _pick_block_b(batch):
    """Largest divisor of `batch` <= 8 that still leaves >= 2 grid steps."""
    best = 1
    for cand in range(1, min(8, batch) + 1):
        if batch % cand == 0 and (batch // cand) >= 2:
            best = cand
    return best


def global_attention_pooling(x, params, block_b=None):
    """x: (B, C, H, W); params: conv-shaped weights/biases of the module."""
    w1, b1, w2, b2, wv, bv = params
    B, C, H, W = x.shape
    N = H * W
    Cr = w1.shape[0]                       # channels // reduction

    if block_b is None:
        block_b = _pick_block_b(B)
    assert B % block_b == 0
    grid_b = B // block_b

    kp = max(8, ((Cr + 7) // 8) * 8)       # hidden rows padded to sublane multiple
    R = kp + 8                             # + 8 rows for [vbar, ones, 0...]

    f32 = jnp.float32
    x_flat = x.reshape(B, C, N).astype(f32)          # free reshape, NCHW -> (B, C, N)

    # Fused weight on x: rows [0:Cr] = W1, row kp = wv_bar (mean-folded value
    # conv), row kp+1 = zero weights with bias 1.0 (constant ones row).
    wx = jnp.zeros((R, C), f32)
    wx = wx.at[:Cr, :].set(w1.reshape(Cr, C).astype(f32))
    wx = wx.at[kp, :].set(wv.reshape(C, C).astype(f32).mean(axis=0))
    bx = jnp.zeros((R, 1), f32)
    bx = bx.at[:Cr, 0].set(b1.astype(f32))
    bx = bx.at[kp, 0].set(bv.astype(f32).mean())
    bx = bx.at[kp + 1, 0].set(1.0)

    # Second attention conv, contraction dim zero-padded to kp.
    w2p = jnp.zeros((C, kp), f32)
    w2p = w2p.at[:, :Cr].set(w2.reshape(C, Cr).astype(f32))
    b2m = b2.reshape(C, 1).astype(f32)

    const2d = lambda shape: pl.BlockSpec(shape, lambda i: (0, 0))

    out = pl.pallas_call(
        _gap_kernel,
        out_shape=jax.ShapeDtypeStruct((B, 1, C), f32),
        grid_spec=pltpu.PrefetchScalarGridSpec(
            num_scalar_prefetch=0,
            grid=(grid_b,),
            in_specs=[
                pl.BlockSpec((block_b, C, N), lambda i: (i, 0, 0)),  # x tokens (C, N)
                const2d((R, C)),                                     # fused [W1; wv_bar; ones]
                const2d((R, 1)),                                     # fused bias
                const2d((C, kp)),                                    # attention[2].weight (padded)
                const2d((C, 1)),                                     # attention[2].bias
            ],
            out_specs=pl.BlockSpec((block_b, 1, C), lambda i: (i, 0, 0)),
        ),
        compiler_params=pltpu.CompilerParams(
            dimension_semantics=("parallel",)),
    )(x_flat, wx, bx, w2p, b2m)

    return out.reshape(B, C)


# ----------------------------------------------------------------------------
# Pure-JAX reference (mirrors the PyTorch forward exactly, full precision)
# ----------------------------------------------------------------------------
def _reference(x, params):
    w1, b1, w2, b2, wv, bv = params
    B, C, H, W = x.shape
    N = H * W
    hp = lax.Precision.HIGHEST

    def conv1x1(t, w, b):
        return (jnp.einsum('oc,bchw->bohw', w[:, :, 0, 0], t, precision=hp)
                + b[None, :, None, None])

    a = jnp.maximum(conv1x1(x, w1, b1), 0.0)
    a = conv1x1(a, w2, b2).reshape(B, C, N)
    a = jax.nn.softmax(a, axis=-1)
    v = conv1x1(x, wv, bv).reshape(B, C, N)
    attended = jnp.einsum('bin,bjn->bij', a, v, precision=hp)   # bmm(a, v^T)
    return attended.mean(axis=-1)                               # (B, C)


# ----------------------------------------------------------------------------
if __name__ == "__main__":
    B, C, H, W = 2, 16, 16, 16
    reduction = 4
    Cr = C // reduction

    key = jax.random.PRNGKey(0)
    ks = jax.random.split(key, 7)

    # Deterministic synthetic parameters (nn.Conv2d 1x1 shapes).
    params = (
        0.3 * jax.random.normal(ks[0], (Cr, C, 1, 1), jnp.float32),  # attention[0].weight
        0.1 * jax.random.normal(ks[1], (Cr,), jnp.float32),          # attention[0].bias
        0.3 * jax.random.normal(ks[2], (C, Cr, 1, 1), jnp.float32),  # attention[2].weight
        0.1 * jax.random.normal(ks[3], (C,), jnp.float32),           # attention[2].bias
        0.3 * jax.random.normal(ks[4], (C, C, 1, 1), jnp.float32),   # value_conv.weight
        0.1 * jax.random.normal(ks[5], (C,), jnp.float32),           # value_conv.bias
    )
    x = jax.random.normal(ks[6], (B, C, H, W), jnp.float32)

    out = global_attention_pooling(x, params)
    jax.block_until_ready(out)

    ref = _reference(x, params)

    assert out.shape == (B, C)
    max_err = float(jnp.max(jnp.abs(out - ref)))
    assert jnp.allclose(out, ref, rtol=1e-4, atol=1e-4), max_err

    print("KERNEL_OK")
</pallas_src>

<mosaic_0001>
module attributes {stable_mosaic.version = 11 : i64} {
  func.func @_gap_kernel(%arg0: i32, %arg1: memref<1x16x256xf32, #tpu.memory_space<vmem>>, %arg2: memref<16x16xf32, #tpu.memory_space<vmem>>, %arg3: memref<16x1xf32, #tpu.memory_space<vmem>>, %arg4: memref<16x8xf32, #tpu.memory_space<vmem>>, %arg5: memref<16x1xf32, #tpu.memory_space<vmem>>, %arg6: memref<1x1x16xf32, #tpu.memory_space<vmem>>) attributes {dimension_semantics = [#tpu.dimension_semantics<parallel>], iteration_bounds = array<i64: 2>, scalar_prefetch = 0 : i64, scratch_operands = 0 : i64, tpu.core_type = #tpu.core_type<tc>, window_params = [{transform_indices = @transform_0, window_bounds = array<i64: 1, 16, 256>}, {pipeline_mode = #tpu.pipeline_mode<synchronous>, transform_indices = @transform_1, window_bounds = array<i64: 16, 16>}, {pipeline_mode = #tpu.pipeline_mode<synchronous>, transform_indices = @transform_2, window_bounds = array<i64: 16, 1>}, {pipeline_mode = #tpu.pipeline_mode<synchronous>, transform_indices = @transform_3, window_bounds = array<i64: 16, 8>}, {pipeline_mode = #tpu.pipeline_mode<synchronous>, transform_indices = @transform_4, window_bounds = array<i64: 16, 1>}, {transform_indices = @transform_5, window_bounds = array<i64: 1, 1, 16>}]} {
    %c0 = arith.constant 0 : index
    %c0_0 = arith.constant 0 : index
    %0 = vector.load %arg2[%c0, %c0_0] : memref<16x16xf32, #tpu.memory_space<vmem>>, vector<16x16xf32>
    %c0_1 = arith.constant 0 : index
    %c0_2 = arith.constant 0 : index
    %1 = vector.load %arg3[%c0_1, %c0_2] : memref<16x1xf32, #tpu.memory_space<vmem>>, vector<16x1xf32>
    %c0_3 = arith.constant 0 : index
    %c0_4 = arith.constant 0 : index
    %2 = vector.load %arg4[%c0_3, %c0_4] : memref<16x8xf32, #tpu.memory_space<vmem>>, vector<16x8xf32>
    %c0_5 = arith.constant 0 : index
    %c0_6 = arith.constant 0 : index
    %3 = vector.load %arg5[%c0_5, %c0_6] : memref<16x1xf32, #tpu.memory_space<vmem>>, vector<16x1xf32>
    %c0_7 = arith.constant 0 : index
    %c0_8 = arith.constant 0 : index
    %c0_9 = arith.constant 0 : index
    %4 = vector.load %arg1[%c0_7, %c0_8, %c0_9] : memref<1x16x256xf32, #tpu.memory_space<vmem>>, vector<1x16x256xf32>
    %5 = vector.shape_cast %4 : vector<1x16x256xf32> to vector<16x256xf32>
    %cst = arith.constant dense<0.000000e+00> : vector<16x256xf32>
    %6 = tpu.matmul %0, %5, %cst {dimension_numbers = #tpu.dot_dimension_numbers<[1], [0], [0], [1], [0, 0, 1, 1], [], []>} : vector<16x16xf32>, vector<16x256xf32>, vector<16x256xf32> -> vector<16x256xf32>
    %7 = vector.broadcast %1 : vector<16x1xf32> to vector<16x256xf32>
    %8 = arith.addf %6, %7 : vector<16x256xf32>
    %9 = vector.extract_strided_slice %8 {offsets = [0, 0], sizes = [8, 256], strides = [1, 1]} : vector<16x256xf32> to vector<8x256xf32>
    %cst_10 = arith.constant 0.000000e+00 : f32
    %10 = vector.broadcast %cst_10 : f32 to vector<8x256xf32>
    %11 = arith.maximumf %9, %10 : vector<8x256xf32>
    %12 = vector.extract_strided_slice %8 {offsets = [8, 0], sizes = [8, 256], strides = [1, 1]} : vector<16x256xf32> to vector<8x256xf32>
    %cst_11 = arith.constant dense<0.000000e+00> : vector<16x256xf32>
    %13 = tpu.matmul %2, %11, %cst_11 {dimension_numbers = #tpu.dot_dimension_numbers<[1], [0], [0], [1], [0, 0, 1, 1], [], []>} : vector<16x8xf32>, vector<8x256xf32>, vector<16x256xf32> -> vector<16x256xf32>
    %14 = vector.broadcast %3 : vector<16x1xf32> to vector<16x256xf32>
    %15 = arith.addf %13, %14 : vector<16x256xf32>
    %cst_12 = arith.constant dense<0xFF800000> : vector<16xf32>
    %16 = vector.multi_reduction <maximumf>, %15, %cst_12 [1] : vector<16x256xf32> to vector<16xf32>
    %17 = vector.shape_cast %16 : vector<16xf32> to vector<16x1xf32>
    %18 = vector.broadcast %17 : vector<16x1xf32> to vector<16x256xf32>
    %19 = arith.subf %15, %18 : vector<16x256xf32>
    %20 = math.exp %19 : vector<16x256xf32>
    %cst_13 = arith.constant dense<0.000000e+00> : vector<8x16xf32>
    %21 = tpu.matmul %12, %20, %cst_13 {dimension_numbers = #tpu.dot_dimension_numbers<[1], [1], [0], [0], [0, 0, 1, 0], [], []>} : vector<8x256xf32>, vector<16x256xf32>, vector<8x16xf32> -> vector<8x16xf32>
    %22 = vector.extract_strided_slice %21 {offsets = [0, 0], sizes = [1, 16], strides = [1, 1]} : vector<8x16xf32> to vector<1x16xf32>
    %23 = vector.extract_strided_slice %21 {offsets = [1, 0], sizes = [1, 16], strides = [1, 1]} : vector<8x16xf32> to vector<1x16xf32>
    %24 = arith.divf %22, %23 : vector<1x16xf32>
    %c0_14 = arith.constant 0 : index
    %c0_15 = arith.constant 0 : index
    %c0_16 = arith.constant 0 : index
    %25 = vector.load %arg6[%c0_14, %c0_15, %c0_16] : memref<1x1x16xf32, #tpu.memory_space<vmem>>, vector<1x1x16xf32>
    %26 = vector.shape_cast %25 : vector<1x1x16xf32> to vector<1x16xf32>
    %27 = vector.shape_cast %24 : vector<1x16xf32> to vector<1x1x16xf32>
    tpu.vector_store %arg6[%c0_14, %c0_15, %c0_16], %27 {strides = array<i32>} : memref<1x1x16xf32, #tpu.memory_space<vmem>>, vector<1x1x16xf32>,
    return
  }
  func.func @transform_0(%arg0: i32) -> (i32, i32, i32) {
    %c0_i32 = arith.constant 0 : i32
    %c0_i32_0 = arith.constant 0 : i32
    %c0_i32_1 = arith.constant 0 : i32
    return %arg0, %c0_i32, %c0_i32_0 : i32, i32, i32
  }
  func.func @transform_1(%arg0: i32) -> (i32, i32) {
    %c0_i32 = arith.constant 0 : i32
    %c0_i32_0 = arith.constant 0 : i32
    %c0_i32_1 = arith.constant 0 : i32
    return %c0_i32, %c0_i32_0 : i32, i32
  }
  func.func @transform_2(%arg0: i32) -> (i32, i32) {
    %c0_i32 = arith.constant 0 : i32
    %c0_i32_0 = arith.constant 0 : i32
    %c0_i32_1 = arith.constant 0 : i32
    return %c0_i32, %c0_i32_0 : i32, i32
  }
  func.func @transform_3(%arg0: i32) -> (i32, i32) {
    %c0_i32 = arith.constant 0 : i32
    %c0_i32_0 = arith.constant 0 : i32
    %c0_i32_1 = arith.constant 0 : i32
    return %c0_i32, %c0_i32_0 : i32, i32
  }
  func.func @transform_4(%arg0: i32) -> (i32, i32) {
    %c0_i32 = arith.constant 0 : i32
    %c0_i32_0 = arith.constant 0 : i32
    %c0_i32_1 = arith.constant 0 : i32
    return %c0_i32, %c0_i32_0 : i32, i32
  }
  func.func @transform_5(%arg0: i32) -> (i32, i32, i32) {
    %c0_i32 = arith.constant 0 : i32
    %c0_i32_0 = arith.constant 0 : i32
    %c0_i32_1 = arith.constant 0 : i32
    return %arg0, %c0_i32, %c0_i32_0 : i32, i32, i32
  }
}

</mosaic_0001>

<bundles_post_ra>
// kernel: tpu_custom_call.1
= control target key start
LH: loop header
LB: loop body
LE: loop exit
PB: predicated region body
PF: predicated region fallthrough
CT: control target
= control target key end

     0   :  { %10 = vsyncpa [#allocation3], 0  ;;  %s991_s0 = inlined_call_operand.hbm [shape: f32[2,16,256], index: 0, kind: input, shape index: {}]   ;;  %s992_s1 = inlined_call_operand.vmem [shape: f32[16,16], index: 1, kind: input, shape index: {}]   ;;  %s993_s2 = inlined_call_operand.vmem [shape: f32[16,1], index: 2, kind: input, shape index: {}]   ;;  %s994_s3 = inlined_call_operand.vmem [shape: f32[16,8], index: 3, kind: input, shape index: {}]   ;;  %s995_s4 = inlined_call_operand.vmem [shape: f32[16,1], index: 4, kind: input, shape index: {}]   ;;  %s996_s5 = inlined_call_operand.hbm [shape: f32[2,1,16], index: 5, kind: output, shape index: {}]  }
   0x1   :  { %12 = vsyncpa [#allocation3 + $0x1], 0 }
   0x2   :  { %13 = vsyncpa [#allocation4], 0 }
   0x3   :  { %15 = vsyncpa [#allocation4 + $0x1], 0  ;;  %s826_s18 = smov 0   ;;  %s828_s19 = smov 0  }
   0x4   :  { %s830_s20 = smov 0   ;;  %s832_s21 = smov 0  }
   0x5 LB: > { %s847_s22 = sadd.s32 4294967295, %s788_s21   ;;  %s618_s23 = sadd.s32 4294967294, %s788_s21   ;;  %s788_s21 = sphi %s832_s21, %s1011_s21   ;;  %s784_s20 = sphi %s830_s20, %s1010_s20   ;;  %s780_s19 = sphi %s828_s19, %s1009_s19   ;;  %s776_s18 = sphi %s826_s18, %s1008_s18  }
   0x6   : > { %s851_s24 = sadd.s32 1, %s788_s21   ;;  %s28_s25 = sadd.s32 1, %s784_s20 }
   0x7   : > { %s25_s26 = ssub.s32 %s788_s21, %s851_s24  ;;  %p35_p0 = scmp.ne.s32.totalorder %s784_s20, %s780_s19 }
   0x8   : > { %p26_p1 = scmp.eq.s32.totalorder %s25_s26, 0  ;;  %p36_p2 = scmp.eq.s32.totalorder %s788_s21, 0 }
   0x9   : > { %p41_p3 = scmp.ne.s32.totalorder %s780_s19, %s776_s18  ;;  %p42_p4 = scmp.eq.s32.totalorder %s847_s22, 0 }
   0xa   : > { %s863_s27 = scalar_select %p26_p1, %s784_s20, %s28_s25  }
   0xb   : > { %p865_p5 = por %p36_p2, %p35_p0  ;;  %p869_p6 = por %p42_p4, %p41_p3 }
   0xc   : > { %p149_p7 = scmp.eq.s32.totalorder %s847_s22, 1  ;;  %p155_p8 = scmp.eq.s32.totalorder %s618_s23, 1 }
   0xd   : > { %s1000_s29 = scalar_select %p869_p6, 1, 0 }
   0xe   : > { %p646_p10 = scmp.lt.s32.totalorder %s788_s21, 2  ;;  %p876_p11 = por %p149_p7, %p35_p0 }
   0xf   : > { %p880_p12 = por %p155_p8, %p41_p3  ;;  %s187_s7 = sand.u32 1, %s784_s20  }
  0x10   : > { %s1001_s30 = scalar_select %p876_p11, 1, 0 }
  0x11   : > { %s1002_s6 = scalar_select %p880_p12, 1, 0 }
  0x12   : > { %s633_s8 = sshll.u32 %s788_s21, 9  ;;  %s621_s9 = sshll.u32 %s187_s7, 5 }
  0x13   : > { %s889_s12 = scalar_lea.hbm %s991_s0, %s633_s8  ;;  %s191_s13 = scalar_lea.vmem [#allocation2], %s621_s9 }
  0x14   : > { %s198_s14 = sshll.u32 %s191_s13, 4  ;;  %p893_p13 = pnand %p646_p10, %p865_p5  ;;  %s897_s14 = int_to_ptr.vmem [resolvable:$true] %s198_s14 }
  0x15   : > { %s899_s16 = scalar_lea.sflag [#allocation3], %s187_s7  ;;  %s696_s17 = scalar_lea.hbm %s889_s12, 512 }
  0x16   : > { %p697_p0 = scmp.ne.s32.totalorder %s889_s12, %s696_s17  ;;  %p698_p1 = pneg %p893_p13 }
  0x17   : > { %s701_s26 = scalar_lea.hbm %s991_s0, 1024  ;;  %p702_p4 = scmp.lt.s32.totalorder %s889_s12, %s991_s0 }
  0x18   : > { %p699_p2 = pnand %p698_p1, %p697_p0  ;;  %p703_p5 = scmp.lt.s32.totalorder %s701_s26, %s696_s17 }
  0x1a   : > { %p700_p3 = pneg %p699_p2  ;;  %p704_p7 = por %p703_p5, %p702_p4 }
  0x1c   : > { %p705_p8 = pnand %p704_p7, %p700_p3 }
  0x1e   : > { %708 = shalt.err (!%p705_p8)
}
  0x1f   : > { %s709_s7 = scalar_lea.vmem %s897_s14, 512  ;;  %s790_s9 = smov [#allocation2]  }
  0x20   : > { %p710_p10 = scmp.ne.s32.totalorder %s897_s14, %s709_s7  ;;  %s714_s10 = sshll.u32 %s790_s9, 4  ;;  %s715_s10 = int_to_ptr.vmem [resolvable:$false] %s714_s10 }
  0x21   : > { %s716_s11 = scalar_lea.vmem %s715_s10, 1024  ;;  %p717_p2 = scmp.lt.s32.totalorder %s897_s14, %s715_s10 }
  0x22   : > { %p712_p9 = pnand %p710_p10, %p698_p1  ;;  %p718_p12 = scmp.lt.s32.totalorder %s716_s11, %s709_s7 }
  0x24   : > { %p713_p0 = pneg %p712_p9  ;;  %p719_p11 = por %p718_p12, %p717_p2 }
  0x26   : > { %p720_p6 = pnand %p719_p11, %p713_p0 }
  0x28   : > { %723 = shalt.err (!%p720_p6)
}
  0x29   : > { %s791_s13 = smov 256   ;;  %s792_s17 = smov 16  }
  0x2a   : > { %641 = dma.hbm_to_vmem [thread:$0]  (!%p893_p13), %s889_s12, 512, %s897_s14, %s899_s16, %s791_s13, %s791_s13, %s792_s17  }
  0x2b   : > { %p624_p9 = scmp.ge.s32.totalorder %s788_s21, 1  ;;  %p206_p1 = scmp.lt.s32.totalorder %s788_s21, 3 }
  0x2d   : > { %p207_p3 = pnand %p624_p9, %p206_p1 }
  0x2e   : > { %s923_s23 = sand.u32 (!%p207_p3), 1, %s780_s19   ;;  %p1004_p6 = scmp.ne.s32.totalorder (!%p207_p3), %s1000_s29, 0 }
  0x2f   : > { %210 = sbr.rel (%p207_p3) target bundleno = 853 (0x355), region = 40  ;;  %s625_s25 = sshll.u32 (!%p207_p3), %s923_s23, 5 }
  0x30   : > { %s213_s26 = scalar_lea.sflag (!%p207_p3), [#allocation3], %s923_s23  ;;  %s216_s28 = scalar_lea.vmem (!%p207_p3), [#allocation2], %s625_s25 }
  0x34   : > { %767 = dma.done.wait (%p1004_p6), %s213_s26, 512  }
  0x35   : > { %769 = vsyncadd (%p1004_p6), %s213_s26, 4294966784  ;;  %v793_v0 = vmov 0.0   ;;  %v794_v1 = vmov 0   ;;  %v253_v2 = vld [vmem:[%s216_s28 + $0x18] sm:$0xff]  ;;  %v252_v3 = vld [vmem:[%s216_s28 + $0x10] sm:$0xff]  ;;  %vm264_vm0 = vcmask 130048  }
  0x36   : > { %335 = vmatprep.mubr.f32.mxu0 %v793_v0  ;;  %684 = vset.pattern.permute.xlu0 %v794_v1  ;;  %v251_v4 = vld [vmem:[%s216_s28 + $0x8] sm:$0xff]  ;;  %v250_v5 = vld [vmem:[%s216_s28] sm:$0xff]  ;;  %vm360_vm1 = vcmask 64512   ;;  %s630_s14 = sshll.u32 %s847_s22, 4  ;;  %s241_s15 = scalar_lea.vmem [#allocation5], %s923_s23  ;;  %vm537_vm2 = vcmask 122880  }
  0x37   : > { %431 = vmatprep.mubr.f32.mxu1 %v793_v0  ;;  %685 = vset.pattern.permute.xlu1 %v794_v1  ;;  %v244_v6 = vld [vmem:[%s993_s2] sm:$0xff]  ;;  %v249_v8 = vld [vmem:[%s995_s4 + $0x8] sm:$0xff]  ;;  %s552_s16 = sshll.u32 %s241_s15, 4  ;;  %s550_s7 = scalar_lea.hbm %s996_s5, %s630_s14  ;;  %s553_s16 = int_to_ptr.vmem [resolvable:$true] %s552_s16 }
  0x38   : > { %299 = vmatprep.subr.mxu0 %v253_v2  ;;  %v242_v7 = vld [vmem:[%s992_s1] sm:$0xff]  ;;  %256 = vperm.xlu0 %684, %v244_v6   ;;  %v243_v10 = vld [vmem:[%s992_s1 + $0x8] sm:$0xff]  ;;  %s540_s9 = scalar_lea.sflag [#allocation4], %s923_s23  ;;  %s724_s10 = scalar_lea.vmem %s553_s16, 16 }
  0x39   : > { %300 = vmatpush1.msra.mxu0 %v252_v3  ;;  %v248_v9 = vld [vmem:[%s995_s4] sm:$0xff]  ;;  %v247_v19 = vld [vmem:[%s994_s3 + $0x8] sm:$0xff]  ;;  %p725_p11 = scmp.ne.s32.totalorder %s553_s16, %s724_s10  ;;  %p1005_p12 = scmp.ne.s32.totalorder %s1001_s30, 0 }
  0x3a   : > { %301 = vmatprep.subr.mxu0 %v251_v4  ;;  %352 = vperm.xlu1 %685, %v248_v9   ;;  %v246_v18 = vld [vmem:[%s994_s3] sm:$0xff]  ;;  %v245_v32 = vld [vmem:[%s993_s2 + $0x8] sm:$0xff]  ;;  %s795_s11 = smov [#allocation5]  }
  0x3b   : > { %302 = vmatpush1.msra.mxu0 %v250_v5  ;;  %p726_p13 = pnand %p725_p11, %p1005_p12  ;;  %s728_s13 = sshll.u32 %s795_s11, 4  ;;  %s729_s13 = int_to_ptr.vmem [resolvable:$false] %s728_s13 }
  0x3c   : > { %626 = vmatmul.mubr.msk.f32.vlgmr.msra.gmra.mxu0 %vm264_vm0, %v242_v7  ;;  %357 = vperm.xlu0 %684, %v249_v8   ;;  %s730_s22 = scalar_lea.vmem %s729_s13, 32  ;;  %p731_p5 = scmp.lt.s32.totalorder %s553_s16, %s729_s13 }
  0x3d   : > { %341 = vmatprep.mubr.f32.mxu0 %v793_v0  ;;  %p727_p4 = pneg %p726_p13  ;;  %p732_p7 = scmp.lt.s32.totalorder %s730_s22, %s724_s10 }
  0x3f   : > { %p733_p8 = por %p732_p7, %p731_p5 }
  0x40   : > { %627 = vmatmul.mubr.msk.f32.gmra.mxu0 %vm264_vm0, %v243_v10 }
  0x41   : > { %p734_p10 = pnand %p733_p8, %p727_p4 }
  0xb3   : > { %v257_v12 = vpop.permute.xlu0 %256 }
  0xb5   : > { %v353_v20 = vpop.permute.xlu1 %352 }
  0xb7   : > { %v358_v27 = vpop.permute.xlu0 %357 }
  0xfc   : > { %v337_v11 = vpop.f32.mrf.mxu0 }
  0xfd   : > { %v338_v13 = vadd.f32 %v337_v11, %v257_v12 }
  0xfe   : > { %v339_v14 = vpop.f32.mrf.mxu0 }
  0xff   : > { %v340_v15 = vadd.f32 %v339_v14, %v257_v12  ;;  %v348_v17 = vmax.f32 %v338_v13, 0.0 }
 0x100   : > { %v343_v34 = vpop.f32.mrf.mxu0 }
 0x101   : > { %v349_v16 = vmax.f32 %v340_v15, 0.0 }
 0x102   : > { %v345_v39 = vpop.f32.mrf.mxu0 }
 0x103   : > { %397 = vmatprep.subr.mxu1 %v349_v16 }
 0x104   : > { %398 = vmatpush1.msra.mxu1 %v348_v17 }
 0x105   : > { %628 = vmatmul.mubr.msk.f32.vlgmr.msra.gmra.mxu1 %vm360_vm1, %v246_v18 }
 0x106   : > { %437 = vmatprep.mubr.f32.mxu1 %v793_v0 }
 0x109   : > { %629 = vmatmul.mubr.msk.f32.gmra.mxu1 %vm360_vm1, %v247_v19 }
 0x1c5   : > { %v433_v21 = vpop.f32.mrf.mxu1 }
 0x1c6   : > { %v434_v23 = vadd.f32 %v433_v21, %v353_v20 }
 0x1c7   : > { %v435_v22 = vpop.f32.mrf.mxu1 }
 0x1c8   : > { %v436_v24 = vadd.f32 %v435_v22, %v353_v20 }
 0x1c9   : > { %v439_v25 = vpop.f32.mrf.mxu1 }
 0x1ca   : > { %v444_v26 = vmax.f32 %v434_v23, %v436_v24  ;;  %v440_v29 = vadd.f32 %v439_v25, %v358_v27 }
 0x1cb   : > { %v441_v28 = vpop.f32.mrf.mxu1 }
 0x1cc   : > { %v442_v30 = vadd.f32 %v441_v28, %v358_v27  ;;  %445 = vmax.xlane.f32.xlu0 %v444_v26 }
 0x1ce   : > { %v447_v31 = vmax.f32 %v440_v29, %v442_v30 }
 0x1d0   : > { %448 = vmax.xlane.f32.xlu1 %v447_v31 }
 0x1e2   : > { %261 = vperm.xlu0 %684, %v245_v32  }
 0x255   : > { %v446_v33 = vpop.xlane.xlu0 %445 }
 0x256   : > { %v451_v35 = vsub.f32 %v436_v24, %v446_v33  ;;  %v450_v40 = vsub.f32 %v434_v23, %v446_v33 }
 0x258   : > { %v456_v43 = vmul.f32 1.442695, %v451_v35  ;;  %v454_v46 = vmul.f32 1.442695, %v450_v40 }
 0x259   : > { %v449_v36 = vpop.xlane.xlu1 %448 }
 0x25a   : > { %v452_v37 = vsub.f32 %v440_v29, %v449_v36  ;;  %v453_v38 = vsub.f32 %v442_v30, %v449_v36 }
 0x25c   : > { %v458_v41 = vmul.f32 1.442695, %v452_v37  ;;  %v460_v42 = vmul.f32 1.442695, %v453_v38 }
 0x25d   : > { %v262_v44 = vpop.permute.xlu0 %261 }
 0x25e   : > { %686 = vpow2.f32 %v458_v41  ;;  %v346_v45 = vadd.f32 %v345_v39, %v262_v44  ;;  %v344_v51 = vadd.f32 %v343_v34, %v262_v44 }
 0x25f   : > { %688 = vpow2.f32 %v460_v42 }
 0x260   : > { %526 = vmatprep.mubr.f32.mxu1 %v346_v45  ;;  %690 = vpow2.f32 %v456_v43 }
 0x261   : > { %692 = vpow2.f32 %v454_v46 }
 0x26b   : > { %v687_v47 = vpop.eup %686 }
 0x26c   : > { %v689_v48 = vpop.eup %688 }
 0x26d   : > { %490 = vmatprep.subr.mxu1 %v689_v48  ;;  %v691_v49 = vpop.eup %690 }
 0x26e   : > { %491 = vmatpush1.xpose.msra.mxu1 %v687_v47  ;;  %v693_v50 = vpop.eup %692 }
 0x26f   : > { %492 = vmatprep.subr.mxu1 %v691_v49 }
 0x272   : > { %493 = vmatpush1.xpose.msra.mxu1 %v693_v50 }
 0x275   : > { %527 = vmatmul.mubr.f32.vlgmr.msra.gmra.mxu1 %v344_v51 }
 0x335   : > { %v528_v52 = vpop.f32.mrf.mxu1 }
 0x336   : > { %v533_v53 = vrot.slane %v528_v52, 1 }
 0x337   : > { %v530_v54 = vpop.f32.mrf.mxu1 }
 0x338   : > { %694 = vrcp.f32 %v533_v53 }
 0x345   : > { %v695_v55 = vpop.eup %694 }
 0x346   : > { %v536_v56 = vmul.f32 %v695_v55, %v528_v52 }
 0x348   : > { %538 = vst.msk [vmem:[%s241_s15] sm:$0x1] %vm537_vm2, %v536_v56 }
 0x349   : > { %737 = shalt.err (!%p734_p10)
}
 0x34a   : > { %s738_s17 = scalar_lea.hbm %s550_s7, 16  ;;  %s742_s26 = scalar_lea.hbm %s996_s5, 32 }
 0x34b   : > { %p739_p0 = scmp.ne.s32.totalorder %s550_s7, %s738_s17  ;;  %p743_p1 = scmp.lt.s32.totalorder %s550_s7, %s996_s5 }
 0x34c   : > { %p744_p3 = scmp.lt.s32.totalorder %s742_s26, %s738_s17 }
 0x34d   : > { %p740_p2 = pnand %p739_p0, %p1005_p12 }
 0x34e   : > { %p745_p6 = por %p744_p3, %p743_p1 }
 0x34f   : > { %p741_p9 = pneg %p740_p2 }
 0x351   : > { %p746_p11 = pnand %p745_p6, %p741_p9 }
 0x353   : > { %749 = shalt.err (!%p746_p11)
}
 0x354   : > { %636 = dma.vmem_to_hbm [thread:$0]  (%p1005_p12), %s553_s16, 16, %s550_s7, %s540_s9  }
 0x355 PF: > { %s564_s14 = sand.u32 1, %s776_s18   ;;  %p1006_p13 = scmp.ne.s32.totalorder %s1002_s6, 0 }
 0x356   : > { %p1007_p4 = scmp.ge.s32.totalorder %s788_s21, 2  ;;  %s565_s15 = scalar_lea.sflag [#allocation4], %s564_s14 }
 0x358   : > { %p643_p5 = pnand %p1007_p4, %p1006_p13 }
 0x35a   : > { %p644_p7 = pneg %p643_p5 }
 0x35c   : > { %771 = dma.done.wait (%p644_p7), %s565_s15, 16  }
 0x35d   : > { %773 = vsyncadd (%p644_p7), %s565_s15, 4294967280  ;;  %p18_p8 = scmp.ge.s32.totalorder %s851_s24, 4   ;;  %s1008_s18 = smov %s780_s19 }
 0x35e   : > { %s1009_s19 = smov %s784_s20  ;;  %s1010_s20 = smov %s863_s27 }
 0x35f   : > { %s1011_s21 = smov %s851_s24  ;;  %20 = sbr.rel (!%p18_p8) target bundleno = 5 (0x5), region = 85 }
 0x364   :  { %569 = vsyncpa [#allocation3], 1 }
 0x365   :  { %571 = vsyncpa [#allocation3 + $0x1], 1 }
 0x366   :  { %572 = vsyncpa [#allocation4], 1 }
 0x367   :  { %574 = vsyncpa [#allocation4 + $0x1], 1 }

</bundles_post_ra>
